<compile_context>
chip_gen: v5e
topology: v5e:2x2
jax: 0.10.0
libtpu: 0.0.40
codegen_flags: <defaults>
</compile_context>

<pallas_src>
import math
import functools

import jax
import jax.numpy as jnp
from jax.experimental import pallas as pl
from jax.experimental.pallas import tpu as pltpu


def _make_chain_kernel(n_blocks, filters, cin, seq_len):
    """Build the fused-chain kernel body (all DenseBlocks in one grid step).

    Kernel refs (in order):
      x_ref                     : (T, Cin)      fp32 input for one batch element
      [wa_i, wb_i, b_i] * n_blk : weights, resident in VMEM
      out_ref                   : (T, C_total)  fp32 [x | act_0 | ... | act_{n-1}]
    """

    def kernel(*refs):
        x_ref = refs[0]
        out_ref = refs[1 + 3 * n_blocks]
        T = seq_len

        x = x_ref[...]                                   # (T, Cin) fp32
        out_ref[:, :cin] = x                             # prefix written once
        c = cin
        for i in range(n_blocks):
            wa_ref = refs[1 + 3 * i]                     # (c, 2F) bf16, tap x[t-d]
            wb_ref = refs[2 + 3 * i]                     # (c, 2F) bf16, tap x[t]
            b_ref = refs[3 + 3 * i]                      # (1, 2F) fp32
            d = 2 ** (i + 1)

            cur = x if i == 0 else out_ref[:, :c]        # (T, c) fp32 stack so far
            keep = max(T - d, 0)                         # rows with a valid t-d tap

            if keep > 0:
                # Causal dilated shift, entirely in VMEM (no extra HBM stream).
                shifted = jnp.concatenate(
                    [jnp.zeros((T - keep, c), jnp.float32), cur[:keep, :]],
                    axis=0)
                acc = (jnp.dot(shifted.astype(jnp.bfloat16), wa_ref[...],
                               preferred_element_type=jnp.float32)
                       + jnp.dot(cur.astype(jnp.bfloat16), wb_ref[...],
                                 preferred_element_type=jnp.float32)
                       + b_ref[...])
            else:
                # dilation >= T: the shifted tap is identically zero.
                acc = (jnp.dot(cur.astype(jnp.bfloat16), wb_ref[...],
                               preferred_element_type=jnp.float32)
                       + b_ref[...])

            xf = acc[:, :filters]
            xg = acc[:, filters:]
            act = jnp.tanh(xf) * jax.nn.sigmoid(xg)      # fp32 gate

            # Write only this block's F new columns.
            out_ref[:, c:c + filters] = act.astype(out_ref.dtype)
            c += filters

    return kernel


def prepare_tc_block_params(params):
    """Pre-pack PyTorch-layout conv weights once (outside the hot path).

    Each block (w1, b1, w2, b2) with w* of shape (F, Cin, 2) becomes
      Wa = [w1[:,:,0]^T | w2[:,:,0]^T]  (Cin, 2F) bf16   (tap 0 -> x[t-d])
      Wb = [w1[:,:,1]^T | w2[:,:,1]^T]  (Cin, 2F) bf16   (tap 1 -> x[t])
      b  = [b1 | b2]                    (1, 2F)   fp32
    """
    packed = []
    for (w1, b1, w2, b2) in params:
        wa = jnp.concatenate([jnp.transpose(w1[:, :, 0]),
                              jnp.transpose(w2[:, :, 0])], axis=1).astype(jnp.bfloat16)
        wb = jnp.concatenate([jnp.transpose(w1[:, :, 1]),
                              jnp.transpose(w2[:, :, 1])], axis=1).astype(jnp.bfloat16)
        bias = jnp.concatenate([b1, b2]).reshape(1, -1).astype(jnp.float32)
        packed.append((wa, wb, bias))
    return packed


def tc_block_forward(x, packed_params):
    """TCBlock forward. x: (B, T, Cin) -> (B, T, Cin + n_blocks*filters), fp32."""
    B, T, Cin = x.shape
    n_blocks = len(packed_params)
    filters = packed_params[0][2].shape[1] // 2
    C_total = Cin + n_blocks * filters

    in_specs = [pl.BlockSpec((None, T, Cin), lambda b: (b, 0, 0))]
    args = [x.astype(jnp.float32)]
    weight_bytes = 0
    for (wa, wb, bias) in packed_params:
        in_specs.append(pl.BlockSpec(wa.shape, lambda b: (0, 0)))
        in_specs.append(pl.BlockSpec(wb.shape, lambda b: (0, 0)))
        in_specs.append(pl.BlockSpec(bias.shape, lambda b: (0, 0)))
        args += [wa, wb, bias]
        weight_bytes += (wa.size * wa.dtype.itemsize
                         + wb.size * wb.dtype.itemsize
                         + bias.size * bias.dtype.itemsize)

    # VMEM budget: double-buffered x/out blocks + resident weights + working set.
    act_bytes = 4 * T * (2 * Cin + 2 * C_total + 4 * C_total)
    vmem_limit = int(min(max(2 * (act_bytes + weight_bytes) + (8 << 20), 32 << 20),
                         96 << 20))

    flops = 0
    for i in range(n_blocks):
        c_i = Cin + i * filters
        flops += B * 2 * (2 * T * c_i * 2 * filters)          # two (T,c)x(c,2F) matmuls
    transcendentals = n_blocks * B * T * 2 * filters           # tanh + sigmoid
    bytes_accessed = 4 * B * T * Cin + 4 * B * T * C_total + weight_bytes
    cost = pl.CostEstimate(flops=flops, transcendentals=transcendentals,
                           bytes_accessed=bytes_accessed)

    kernel = _make_chain_kernel(n_blocks, filters, Cin, T)

    out = pl.pallas_call(
        kernel,
        out_shape=jax.ShapeDtypeStruct((B, T, C_total), jnp.float32),
        grid=(B,),
        in_specs=in_specs,
        out_specs=pl.BlockSpec((None, T, C_total), lambda b: (b, 0, 0)),
        compiler_params=pltpu.CompilerParams(
            dimension_semantics=("parallel",),
            vmem_limit_bytes=vmem_limit,
        ),
        cost_estimate=cost,
    )(*args)
    return out


def init_tc_block_params(key, in_channels, seq_length, filters):
    """Deterministic parameter init matching the PyTorch module's shapes."""
    n_blocks = int(math.ceil(math.log(seq_length, 2)))
    params = []
    for i in range(n_blocks):
        cin = in_channels + i * filters
        key, k1, k2, k3, k4 = jax.random.split(key, 5)
        bound = 1.0 / math.sqrt(cin * 2)  # PyTorch Conv1d default init scale
        w1 = jax.random.uniform(k1, (filters, cin, 2), jnp.float32, -bound, bound)
        b1 = jax.random.uniform(k2, (filters,), jnp.float32, -bound, bound)
        w2 = jax.random.uniform(k3, (filters, cin, 2), jnp.float32, -bound, bound)
        b2 = jax.random.uniform(k4, (filters,), jnp.float32, -bound, bound)
        params.append((w1, b1, w2, b2))
    return params


def _reference_forward(x, params):
    """Pure-JAX reference with the same bf16-in / fp32-accumulate precision."""
    out = x
    for i, (w1, b1, w2, b2) in enumerate(params):
        d = 2 ** (i + 1)
        T = out.shape[1]
        xs = jnp.pad(out, ((0, 0), (d, 0), (0, 0)))[:, :T, :]
        xb = out.astype(jnp.bfloat16)
        xsb = xs.astype(jnp.bfloat16)
        w1b = w1.astype(jnp.bfloat16)
        w2b = w2.astype(jnp.bfloat16)
        xf = (jnp.einsum('btc,fc->btf', xsb, w1b[:, :, 0],
                         preferred_element_type=jnp.float32)
              + jnp.einsum('btc,fc->btf', xb, w1b[:, :, 1],
                           preferred_element_type=jnp.float32) + b1)
        xg = (jnp.einsum('btc,fc->btf', xsb, w2b[:, :, 0],
                         preferred_element_type=jnp.float32)
              + jnp.einsum('btc,fc->btf', xb, w2b[:, :, 1],
                           preferred_element_type=jnp.float32) + b2)
        act = jnp.tanh(xf) * jax.nn.sigmoid(xg)
        out = jnp.concatenate([out, act], axis=-1)
    return out


if __name__ == "__main__":
    B = 2
    seq_length = 8
    in_channels = 8
    filters = 8

    key = jax.random.PRNGKey(0)
    key, xk = jax.random.split(key)
    x = jax.random.normal(xk, (B, seq_length, in_channels), jnp.float32)

    params = init_tc_block_params(key, in_channels, seq_length, filters)
    packed = prepare_tc_block_params(params)

    out = tc_block_forward(x, packed)
    out = jax.block_until_ready(out)

    n_blocks = int(math.ceil(math.log(seq_length, 2)))
    assert out.shape == (B, seq_length, in_channels + n_blocks * filters), out.shape

    ref = jax.block_until_ready(_reference_forward(x, params))
    assert jnp.allclose(out, ref, atol=2e-3, rtol=2e-3), (
        "mismatch vs reference: max err %g" % float(jnp.max(jnp.abs(out - ref))))

    print("KERNEL_OK")
</pallas_src>

<mosaic_0001>
module attributes {stable_mosaic.version = 11 : i64} {
  func.func @kernel(%arg0: i32, %arg1: memref<1x8x8xf32, #tpu.memory_space<vmem>>, %arg2: memref<8x16xbf16, #tpu.memory_space<vmem>>, %arg3: memref<8x16xbf16, #tpu.memory_space<vmem>>, %arg4: memref<1x16xf32, #tpu.memory_space<vmem>>, %arg5: memref<16x16xbf16, #tpu.memory_space<vmem>>, %arg6: memref<16x16xbf16, #tpu.memory_space<vmem>>, %arg7: memref<1x16xf32, #tpu.memory_space<vmem>>, %arg8: memref<24x16xbf16, #tpu.memory_space<vmem>>, %arg9: memref<24x16xbf16, #tpu.memory_space<vmem>>, %arg10: memref<1x16xf32, #tpu.memory_space<vmem>>, %arg11: memref<1x8x32xf32, #tpu.memory_space<vmem>>) attributes {dimension_semantics = [#tpu.dimension_semantics<parallel>], iteration_bounds = array<i64: 2>, scalar_prefetch = 0 : i64, scratch_operands = 0 : i64, tpu.core_type = #tpu.core_type<tc>, window_params = [{transform_indices = @transform_0, window_bounds = array<i64: 1, 8, 8>}, {pipeline_mode = #tpu.pipeline_mode<synchronous>, transform_indices = @transform_1, window_bounds = array<i64: 8, 16>}, {pipeline_mode = #tpu.pipeline_mode<synchronous>, transform_indices = @transform_2, window_bounds = array<i64: 8, 16>}, {pipeline_mode = #tpu.pipeline_mode<synchronous>, transform_indices = @transform_3, window_bounds = array<i64: 1, 16>}, {pipeline_mode = #tpu.pipeline_mode<synchronous>, transform_indices = @transform_4, window_bounds = array<i64: 16, 16>}, {pipeline_mode = #tpu.pipeline_mode<synchronous>, transform_indices = @transform_5, window_bounds = array<i64: 16, 16>}, {pipeline_mode = #tpu.pipeline_mode<synchronous>, transform_indices = @transform_6, window_bounds = array<i64: 1, 16>}, {pipeline_mode = #tpu.pipeline_mode<synchronous>, transform_indices = @transform_7, window_bounds = array<i64: 24, 16>}, {pipeline_mode = #tpu.pipeline_mode<synchronous>, transform_indices = @transform_8, window_bounds = array<i64: 24, 16>}, {pipeline_mode = #tpu.pipeline_mode<synchronous>, transform_indices = @transform_9, window_bounds = array<i64: 1, 16>}, {transform_indices = @transform_10, window_bounds = array<i64: 1, 8, 32>}]} {
    %c0 = arith.constant 0 : index
    %c0_0 = arith.constant 0 : index
    %c0_1 = arith.constant 0 : index
    %0 = vector.load %arg1[%c0, %c0_0, %c0_1] : memref<1x8x8xf32, #tpu.memory_space<vmem>>, vector<1x8x8xf32>
    %1 = vector.shape_cast %0 : vector<1x8x8xf32> to vector<8x8xf32>
    %c0_2 = arith.constant 0 : index
    %c0_3 = arith.constant 0 : index
    %c0_4 = arith.constant 0 : index
    %2 = vector.load %arg11[%c0_2, %c0_3, %c0_4] : memref<1x8x32xf32, #tpu.memory_space<vmem>>, vector<1x8x8xf32>
    %3 = vector.shape_cast %2 : vector<1x8x8xf32> to vector<8x8xf32>
    %4 = vector.shape_cast %1 : vector<8x8xf32> to vector<1x8x8xf32>
    tpu.vector_store %arg11[%c0_2, %c0_3, %c0_4], %4 {strides = array<i32>} : memref<1x8x32xf32, #tpu.memory_space<vmem>>, vector<1x8x8xf32>,
    %cst = arith.constant 0.000000e+00 : f32
    %5 = vector.broadcast %cst : f32 to vector<2x8xf32>
    %6 = vector.extract_strided_slice %1 {offsets = [0, 0], sizes = [6, 8], strides = [1, 1]} : vector<8x8xf32> to vector<6x8xf32>
    %7 = tpu.concatenate %5, %6 in 0 : vector<2x8xf32>, vector<6x8xf32> -> vector<8x8xf32>
    %8 = arith.truncf %7 : vector<8x8xf32> to vector<8x8xbf16>
    %c0_5 = arith.constant 0 : index
    %c0_6 = arith.constant 0 : index
    %9 = vector.load %arg2[%c0_5, %c0_6] : memref<8x16xbf16, #tpu.memory_space<vmem>>, vector<8x16xbf16>
    %cst_7 = arith.constant dense<0.000000e+00> : vector<8x16xf32>
    %10 = tpu.matmul %8, %9, %cst_7 {dimension_numbers = #tpu.dot_dimension_numbers<[1], [0], [0], [1], [0, 0, 1, 1], [], []>} : vector<8x8xbf16>, vector<8x16xbf16>, vector<8x16xf32> -> vector<8x16xf32>
    %11 = arith.truncf %1 : vector<8x8xf32> to vector<8x8xbf16>
    %c0_8 = arith.constant 0 : index
    %c0_9 = arith.constant 0 : index
    %12 = vector.load %arg3[%c0_8, %c0_9] : memref<8x16xbf16, #tpu.memory_space<vmem>>, vector<8x16xbf16>
    %cst_10 = arith.constant dense<0.000000e+00> : vector<8x16xf32>
    %13 = tpu.matmul %11, %12, %cst_10 {dimension_numbers = #tpu.dot_dimension_numbers<[1], [0], [0], [1], [0, 0, 1, 1], [], []>} : vector<8x8xbf16>, vector<8x16xbf16>, vector<8x16xf32> -> vector<8x16xf32>
    %14 = arith.addf %10, %13 : vector<8x16xf32>
    %c0_11 = arith.constant 0 : index
    %c0_12 = arith.constant 0 : index
    %15 = vector.load %arg4[%c0_11, %c0_12] : memref<1x16xf32, #tpu.memory_space<vmem>>, vector<1x16xf32>
    %16 = vector.broadcast %15 : vector<1x16xf32> to vector<8x16xf32>
    %17 = arith.addf %14, %16 : vector<8x16xf32>
    %18 = vector.extract_strided_slice %17 {offsets = [0, 0], sizes = [8, 8], strides = [1, 1]} : vector<8x16xf32> to vector<8x8xf32>
    %19 = vector.extract_strided_slice %17 {offsets = [0, 8], sizes = [8, 8], strides = [1, 1]} : vector<8x16xf32> to vector<8x8xf32>
    %20 = math.tanh %18 : vector<8x8xf32>
    %21 = arith.negf %19 : vector<8x8xf32>
    %22 = math.exp %21 : vector<8x8xf32>
    %cst_13 = arith.constant 1.000000e+00 : f32
    %23 = vector.broadcast %cst_13 : f32 to vector<8x8xf32>
    %24 = arith.addf %23, %22 : vector<8x8xf32>
    %25 = arith.divf %23, %24 : vector<8x8xf32>
    %26 = arith.mulf %20, %25 : vector<8x8xf32>
    %c0_14 = arith.constant 0 : index
    %c0_15 = arith.constant 0 : index
    %c8 = arith.constant 8 : index
    %27 = vector.load %arg11[%c0_14, %c0_15, %c8] : memref<1x8x32xf32, #tpu.memory_space<vmem>>, vector<1x8x8xf32>
    %28 = vector.shape_cast %27 : vector<1x8x8xf32> to vector<8x8xf32>
    %29 = vector.shape_cast %26 : vector<8x8xf32> to vector<1x8x8xf32>
    tpu.vector_store %arg11[%c0_14, %c0_15, %c8], %29 {strides = array<i32>} : memref<1x8x32xf32, #tpu.memory_space<vmem>>, vector<1x8x8xf32>,
    %c0_16 = arith.constant 0 : index
    %c0_17 = arith.constant 0 : index
    %c0_18 = arith.constant 0 : index
    %30 = vector.load %arg11[%c0_16, %c0_17, %c0_18] : memref<1x8x32xf32, #tpu.memory_space<vmem>>, vector<1x8x16xf32>
    %31 = vector.shape_cast %30 : vector<1x8x16xf32> to vector<8x16xf32>
    %cst_19 = arith.constant 0.000000e+00 : f32
    %32 = vector.broadcast %cst_19 : f32 to vector<4x16xf32>
    %33 = vector.extract_strided_slice %31 {offsets = [0, 0], sizes = [4, 16], strides = [1, 1]} : vector<8x16xf32> to vector<4x16xf32>
    %34 = tpu.concatenate %32, %33 in 0 : vector<4x16xf32>, vector<4x16xf32> -> vector<8x16xf32>
    %35 = arith.truncf %34 : vector<8x16xf32> to vector<8x16xbf16>
    %c0_20 = arith.constant 0 : index
    %c0_21 = arith.constant 0 : index
    %36 = vector.load %arg5[%c0_20, %c0_21] : memref<16x16xbf16, #tpu.memory_space<vmem>>, vector<16x16xbf16>
    %cst_22 = arith.constant dense<0.000000e+00> : vector<8x16xf32>
    %37 = tpu.matmul %35, %36, %cst_22 {dimension_numbers = #tpu.dot_dimension_numbers<[1], [0], [0], [1], [0, 0, 1, 1], [], []>} : vector<8x16xbf16>, vector<16x16xbf16>, vector<8x16xf32> -> vector<8x16xf32>
    %38 = arith.truncf %31 : vector<8x16xf32> to vector<8x16xbf16>
    %c0_23 = arith.constant 0 : index
    %c0_24 = arith.constant 0 : index
    %39 = vector.load %arg6[%c0_23, %c0_24] : memref<16x16xbf16, #tpu.memory_space<vmem>>, vector<16x16xbf16>
    %cst_25 = arith.constant dense<0.000000e+00> : vector<8x16xf32>
    %40 = tpu.matmul %38, %39, %cst_25 {dimension_numbers = #tpu.dot_dimension_numbers<[1], [0], [0], [1], [0, 0, 1, 1], [], []>} : vector<8x16xbf16>, vector<16x16xbf16>, vector<8x16xf32> -> vector<8x16xf32>
    %41 = arith.addf %37, %40 : vector<8x16xf32>
    %c0_26 = arith.constant 0 : index
    %c0_27 = arith.constant 0 : index
    %42 = vector.load %arg7[%c0_26, %c0_27] : memref<1x16xf32, #tpu.memory_space<vmem>>, vector<1x16xf32>
    %43 = vector.broadcast %42 : vector<1x16xf32> to vector<8x16xf32>
    %44 = arith.addf %41, %43 : vector<8x16xf32>
    %45 = vector.extract_strided_slice %44 {offsets = [0, 0], sizes = [8, 8], strides = [1, 1]} : vector<8x16xf32> to vector<8x8xf32>
    %46 = vector.extract_strided_slice %44 {offsets = [0, 8], sizes = [8, 8], strides = [1, 1]} : vector<8x16xf32> to vector<8x8xf32>
    %47 = math.tanh %45 : vector<8x8xf32>
    %48 = arith.negf %46 : vector<8x8xf32>
    %49 = math.exp %48 : vector<8x8xf32>
    %cst_28 = arith.constant 1.000000e+00 : f32
    %50 = vector.broadcast %cst_28 : f32 to vector<8x8xf32>
    %51 = arith.addf %50, %49 : vector<8x8xf32>
    %52 = arith.divf %50, %51 : vector<8x8xf32>
    %53 = arith.mulf %47, %52 : vector<8x8xf32>
    %c0_29 = arith.constant 0 : index
    %c0_30 = arith.constant 0 : index
    %c16 = arith.constant 16 : index
    %54 = vector.load %arg11[%c0_29, %c0_30, %c16] : memref<1x8x32xf32, #tpu.memory_space<vmem>>, vector<1x8x8xf32>
    %55 = vector.shape_cast %54 : vector<1x8x8xf32> to vector<8x8xf32>
    %56 = vector.shape_cast %53 : vector<8x8xf32> to vector<1x8x8xf32>
    tpu.vector_store %arg11[%c0_29, %c0_30, %c16], %56 {strides = array<i32>} : memref<1x8x32xf32, #tpu.memory_space<vmem>>, vector<1x8x8xf32>,
    %c0_31 = arith.constant 0 : index
    %c0_32 = arith.constant 0 : index
    %c0_33 = arith.constant 0 : index
    %57 = vector.load %arg11[%c0_31, %c0_32, %c0_33] : memref<1x8x32xf32, #tpu.memory_space<vmem>>, vector<1x8x24xf32>
    %58 = vector.shape_cast %57 : vector<1x8x24xf32> to vector<8x24xf32>
    %59 = arith.truncf %58 : vector<8x24xf32> to vector<8x24xbf16>
    %c0_34 = arith.constant 0 : index
    %c0_35 = arith.constant 0 : index
    %60 = vector.load %arg9[%c0_34, %c0_35] : memref<24x16xbf16, #tpu.memory_space<vmem>>, vector<24x16xbf16>
    %cst_36 = arith.constant dense<0.000000e+00> : vector<8x16xf32>
    %61 = tpu.matmul %59, %60, %cst_36 {dimension_numbers = #tpu.dot_dimension_numbers<[1], [0], [0], [1], [0, 0, 1, 1], [], []>} : vector<8x24xbf16>, vector<24x16xbf16>, vector<8x16xf32> -> vector<8x16xf32>
    %c0_37 = arith.constant 0 : index
    %c0_38 = arith.constant 0 : index
    %62 = vector.load %arg10[%c0_37, %c0_38] : memref<1x16xf32, #tpu.memory_space<vmem>>, vector<1x16xf32>
    %63 = vector.broadcast %62 : vector<1x16xf32> to vector<8x16xf32>
    %64 = arith.addf %61, %63 : vector<8x16xf32>
    %65 = vector.extract_strided_slice %64 {offsets = [0, 0], sizes = [8, 8], strides = [1, 1]} : vector<8x16xf32> to vector<8x8xf32>
    %66 = vector.extract_strided_slice %64 {offsets = [0, 8], sizes = [8, 8], strides = [1, 1]} : vector<8x16xf32> to vector<8x8xf32>
    %67 = math.tanh %65 : vector<8x8xf32>
    %68 = arith.negf %66 : vector<8x8xf32>
    %69 = math.exp %68 : vector<8x8xf32>
    %cst_39 = arith.constant 1.000000e+00 : f32
    %70 = vector.broadcast %cst_39 : f32 to vector<8x8xf32>
    %71 = arith.addf %70, %69 : vector<8x8xf32>
    %72 = arith.divf %70, %71 : vector<8x8xf32>
    %73 = arith.mulf %67, %72 : vector<8x8xf32>
    %c0_40 = arith.constant 0 : index
    %c0_41 = arith.constant 0 : index
    %c24 = arith.constant 24 : index
    %74 = vector.load %arg11[%c0_40, %c0_41, %c24] : memref<1x8x32xf32, #tpu.memory_space<vmem>>, vector<1x8x8xf32>
    %75 = vector.shape_cast %74 : vector<1x8x8xf32> to vector<8x8xf32>
    %76 = vector.shape_cast %73 : vector<8x8xf32> to vector<1x8x8xf32>
    tpu.vector_store %arg11[%c0_40, %c0_41, %c24], %76 {strides = array<i32>} : memref<1x8x32xf32, #tpu.memory_space<vmem>>, vector<1x8x8xf32>,
    return
  }
  func.func @transform_0(%arg0: i32) -> (i32, i32, i32) {
    %c0_i32 = arith.constant 0 : i32
    %c0_i32_0 = arith.constant 0 : i32
    %c0_i32_1 = arith.constant 0 : i32
    return %arg0, %c0_i32, %c0_i32_0 : i32, i32, i32
  }
  func.func @transform_1(%arg0: i32) -> (i32, i32) {
    %c0_i32 = arith.constant 0 : i32
    %c0_i32_0 = arith.constant 0 : i32
    %c0_i32_1 = arith.constant 0 : i32
    return %c0_i32, %c0_i32_0 : i32, i32
  }
  func.func @transform_2(%arg0: i32) -> (i32, i32) {
    %c0_i32 = arith.constant 0 : i32
    %c0_i32_0 = arith.constant 0 : i32
    %c0_i32_1 = arith.constant 0 : i32
    return %c0_i32, %c0_i32_0 : i32, i32
  }
  func.func @transform_3(%arg0: i32) -> (i32, i32) {
    %c0_i32 = arith.constant 0 : i32
    %c0_i32_0 = arith.constant 0 : i32
    %c0_i32_1 = arith.constant 0 : i32
    return %c0_i32, %c0_i32_0 : i32, i32
  }
  func.func @transform_4(%arg0: i32) -> (i32, i32) {
    %c0_i32 = arith.constant 0 : i32
    %c0_i32_0 = arith.constant 0 : i32
    %c0_i32_1 = arith.constant 0 : i32
    return %c0_i32, %c0_i32_0 : i32, i32
  }
  func.func @transform_5(%arg0: i32) -> (i32, i32) {
    %c0_i32 = arith.constant 0 : i32
    %c0_i32_0 = arith.constant 0 : i32
    %c0_i32_1 = arith.constant 0 : i32
    return %c0_i32, %c0_i32_0 : i32, i32
  }
  func.func @transform_6(%arg0: i32) -> (i32, i32) {
    %c0_i32 = arith.constant 0 : i32
    %c0_i32_0 = arith.constant 0 : i32
    %c0_i32_1 = arith.constant 0 : i32
    return %c0_i32, %c0_i32_0 : i32, i32
  }
  func.func @transform_7(%arg0: i32) -> (i32, i32) {
    %c0_i32 = arith.constant 0 : i32
    %c0_i32_0 = arith.constant 0 : i32
    %c0_i32_1 = arith.constant 0 : i32
    return %c0_i32, %c0_i32_0 : i32, i32
  }
  func.func @transform_8(%arg0: i32) -> (i32, i32) {
    %c0_i32 = arith.constant 0 : i32
    %c0_i32_0 = arith.constant 0 : i32
    %c0_i32_1 = arith.constant 0 : i32
    return %c0_i32, %c0_i32_0 : i32, i32
  }
  func.func @transform_9(%arg0: i32) -> (i32, i32) {
    %c0_i32 = arith.constant 0 : i32
    %c0_i32_0 = arith.constant 0 : i32
    %c0_i32_1 = arith.constant 0 : i32
    return %c0_i32, %c0_i32_0 : i32, i32
  }
  func.func @transform_10(%arg0: i32) -> (i32, i32, i32) {
    %c0_i32 = arith.constant 0 : i32
    %c0_i32_0 = arith.constant 0 : i32
    %c0_i32_1 = arith.constant 0 : i32
    return %arg0, %c0_i32, %c0_i32_0 : i32, i32, i32
  }
}

</mosaic_0001>

<bundles_post_ra>
// kernel: tpu_custom_call.1
= control target key start
LH: loop header
LB: loop body
LE: loop exit
PB: predicated region body
PF: predicated region fallthrough
CT: control target
= control target key end

     0   :  { %15 = vsyncpa [#allocation3], 0  ;;  %s1200_s0 = inlined_call_operand.vmem [shape: f32[2,8,8], index: 0, kind: input, shape index: {}]   ;;  %s1201_s1 = inlined_call_operand.hbm [shape: bf16[8,16], index: 1, kind: input, shape index: {}]   ;;  %s1202_s2 = inlined_call_operand.hbm [shape: bf16[8,16], index: 2, kind: input, shape index: {}]   ;;  %s1203_s3 = inlined_call_operand.vmem [shape: f32[1,16], index: 3, kind: input, shape index: {}]   ;;  %s1204_s4 = inlined_call_operand.vmem [shape: bf16[16,16], index: 4, kind: input, shape index: {}]   ;;  %s1205_s5 = inlined_call_operand.vmem [shape: bf16[16,16], index: 5, kind: input, shape index: {}]   ;;  %s1206_s6 = inlined_call_operand.vmem [shape: f32[1,16], index: 6, kind: input, shape index: {}]   ;;  %s1207_s7 = inlined_call_operand.vmem [shape: bf16[24,16], index: 7, kind: input, shape index: {}]   ;;  %s1208_s8 = inlined_call_operand.vmem [shape: bf16[24,16], index: 8, kind: input, shape index: {}]   ;;  %s1209_s9 = inlined_call_operand.vmem [shape: f32[1,16], index: 9, kind: input, shape index: {}]   ;;  %s1210_s10 = inlined_call_operand.hbm [shape: f32[2,8,32], index: 10, kind: output, shape index: {}]  }
   0x1   :  { %16 = vsyncpa [#allocation6], 0 }
   0x2   :  { %17 = vsyncpa [#allocation4], 0 }
   0x3   :  { %19 = vsyncpa [#allocation4 + $0x1], 0  ;;  %s1046_s13 = smov 0   ;;  %s1048_s14 = smov 0  }
   0x4   :  { %s1050_s15 = smov 0   ;;  %s1052_s7 = smov 0  }
   0x5 LB: > { %s1067_s16 = sadd.s32 4294967295, %s983_s7   ;;  %s731_s17 = sadd.s32 4294967294, %s983_s7   ;;  %s983_s7 = sphi %s1052_s7, %s1217_s7   ;;  %s979_s15 = sphi %s1050_s15, %s1216_s15   ;;  %s975_s14 = sphi %s1048_s14, %s1215_s14   ;;  %s971_s13 = sphi %s1046_s13, %s1214_s13  }
   0x6   : > { %s1071_s18 = sadd.s32 1, %s983_s7   ;;  %s247_s19 = sadd.s32 1, %s979_s15 }
   0x7   : > { %s244_s20 = ssub.s32 %s983_s7, %s1071_s18  ;;  %p257_p0 = scmp.ne.s32.totalorder %s979_s15, %s975_s14 }
   0x8   : > { %p245_p1 = scmp.eq.s32.totalorder %s244_s20, 0  ;;  %p258_p2 = scmp.eq.s32.totalorder %s1067_s16, 1 }
   0x9   : > { %p263_p3 = scmp.ne.s32.totalorder %s975_s14, %s971_s13  ;;  %p264_p4 = scmp.eq.s32.totalorder %s731_s17, 1 }
   0xa   : > { %s1082_s21 = scalar_select %p245_p1, %s979_s15, %s247_s19  }
   0xb   : > { %p1084_p5 = por %p258_p2, %p257_p0  ;;  %p1088_p6 = por %p264_p4, %p263_p3 }
   0xc   : > { %p732_p7 = scmp.ge.s32.totalorder %s983_s7, 1  ;;  %p271_p8 = scmp.lt.s32.totalorder %s983_s7, 3 }
   0xd   : > { %p789_p9 = scmp.eq.s32.totalorder %s1067_s16, 0  ;;  %s283_s27 = sshll.u32 %s1201_s1, 4  ;;  %s284_s27 = int_to_ptr.hbm [resolvable:$true] %s283_s27 }
   0xe   : > { %p1095_p10 = pnand %p732_p7, %p271_p8  ;;  %s985_s28 = smov [#allocation2]  }
   0xf   : > { %s285_s29 = sshll.u32 %s985_s28, 4  ;;  %s295_s12 = sshll.u32 %s1202_s2, 4  ;;  %s286_s29 = int_to_ptr.vmem [resolvable:$true] %s285_s29  ;;  %s296_s12 = int_to_ptr.hbm [resolvable:$true] %s295_s12 }
  0x10   : > { %p778_p11 = pneg %p1095_p10  ;;  %s986_s17 = smov [#allocation5]  }
  0x11   : > { %s297_s19 = sshll.u32 %s986_s17, 4  ;;  %338 = sbr.rel (%p1095_p10) target bundleno = 1189 (0x4a5), region = 60  ;;  %s298_s19 = int_to_ptr.vmem [resolvable:$true] %s297_s19 }
  0x12   : > { %p779_p12 = pnand %p789_p9, %p778_p11 }
  0x14   : > { %781 = dma.hbm_to_vmem [thread:$0]  (!%p779_p12), %s284_s27, 64, %s286_s29, [#allocation3]  }
  0x15   : > { %784 = dma.hbm_to_vmem [thread:$0]  (!%p779_p12), %s296_s12, 64, %s298_s19, [#allocation6]  }
  0x16   : > { %958 = dma.done.wait (%p789_p9), [#allocation3], 64  }
  0x17   : > { %960 = vsyncadd (%p789_p9), [#allocation3], 4294967232 }
  0x18   : > { %962 = dma.done.wait (%p789_p9), [#allocation6], 64  }
  0x19   : > { %964 = vsyncadd (%p789_p9), [#allocation6], 4294967232  ;;  %s378_s20 = sand.u32 1, %s975_s14   ;;  %p381_p13 = scmp.lt.s32.totalorder %s1067_s16, 1  ;;  %vm401_vm0 = vcmask 1043456   ;;  %vm387_vm1 = vcmask 64512  }
  0x1a   : > { %s739_s24 = sshll.u32 %s378_s20, 3  ;;  %v397_v0 = vld [vmem:[#allocation5] sm:$0xf]  ;;  %v395_v1 = vld [vmem:[#allocation2] sm:$0xf]  ;;  %vm392_vm2 = vcmask 1041408  }
  0x1b   : > { %s382_s25 = scalar_select %p381_p13, %s1067_s16, 1  ;;  %v403_v3 = vsel %vm401_vm0, %v397_v0, 0  ;;  %v422_v4 = vsel %vm401_vm0, %v395_v1, 0  ;;  %v832_v10 = vld [vmem:[%s1203_s3] ss:$0 sm:$0xff]  ;;  %vm471_vm7 = vcmask 130112  }
  0x1c   : > { %s1129_s30 = scalar_lea.vmem [#allocation7], %s739_s24  ;;  %412 = vmatpush.bf16.msra.mxu0 %v403_v3  ;;  %431 = vmatpush.bf16.msra.mxu1 %v422_v4  ;;  %s987_s17 = smov 120   ;;  %v766_v32 = vld [vmem:[%s1205_s5] sm:$0xff]  ;;  %vm490_vm8 = vcmask 130048   ;;  %v569_v60 = vld [vmem:[%s1208_s8 + $0x8] sm:$0xf] }
  0x1d   : > { %s740_s26 = sshll.u32 %s382_s25, 3  ;;  %s988_s19 = smov 8   ;;  %501 = vmatpush.bf16.msra.mxu2 %v766_v32  ;;  %v765_v33 = vld [vmem:[%s1204_s4] sm:$0xff]  ;;  %v579_v61 = vunpack.c.l.b16 %v569_v60  ;;  %vm563_vm13 = vcmask 195712   ;;  %vm583_vm14 = vcmask 195584  }
  0x1e   : > { %s384_s29 = scalar_lea.vmem %s1200_s0, %s740_s26  ;;  %523 = vmatpush.bf16.msra.mxu3 %v765_v33  ;;  %v833_v41 = vld [vmem:[%s1206_s6] ss:$0 sm:$0xff]  ;;  %s990_s28 = smov 24  }
  0x1f   : > { %v386_v2 = vld [vmem:[%s384_s29] sm:$0xff]  ;;  %v581_v62 = vpack.c.b16 %v579_v61, %v579_v61  ;;  %s762_s29 = sshll.u32 %s1067_s16, 3  ;;  %s647_s24 = sshll.u32 %s1129_s30, 4  ;;  %s648_s24 = int_to_ptr.vmem [resolvable:$true] %s647_s24 }
  0x20   : > { %388 = vst.msk [vmem:[%s1129_s30] sm:$0xff] %vm387_vm1, %v386_v2  ;;  %v396_v5 = vpack.c.bf16 %v386_v2, %v386_v2  ;;  %v390_v6 = vrot.slane %v386_v2, 6  ;;  %v767_v3 = vld [vmem:[%s1208_s8] sm:$0xff] }
  0x21   : > { %v588_v63 = vsel %vm401_vm0, %v581_v62, 0 }
  0x22   : > { %v393_v7 = vsel %vm392_vm2, 0.0, %v390_v6  ;;  %741 = vmatmul.msk.bf16.vlgmr.msra.gmra.mxu0 %vm387_vm1, %v396_v5 }
  0x23   : > { %v394_v8 = vpack.c.bf16 %v393_v7, %v393_v7  ;;  %596 = vmatpush.bf16.msrb.mxu0 %v588_v63  ;;  %v834_v7 = vld [vmem:[%s1209_s9] ss:$0 sm:$0xff] }
  0x25   : > { %742 = vmatmul.msk.bf16.vlgmr.msra.gmra.mxu1 %vm387_vm1, %v394_v8 }
  0x27   : > { %597 = vmatpush.bf16.msrb.mxu0 %v767_v3 }
  0x9f   : > { %v414_v9 = vpop.f32.mrf.mxu0 }
  0xa2   : > { %v433_v11 = vpop.f32.mrf.mxu1 }
  0xa3   : > { %v434_v12 = vadd.f32 %v433_v11, %v414_v9 }
  0xa5   : > { %v441_v13 = vadd.f32 %v832_v10, %v434_v12 }
  0xa7   : > { %v743_v14 = vmul.f32 -1.442695, %v441_v13  ;;  %v416_v15 = vpop.f32.mrf.mxu0 }
  0xa9   : > { %835 = vpow2.f32 %v743_v14 }
  0xaa   : > { %v435_v16 = vpop.f32.mrf.mxu1 }
  0xaf   : > { %v836_v17 = vpop.eup %835 }
  0xb0   : > { %v446_v18 = vadd.f32 1.0, %v836_v17 }
  0xb2   : > { %837 = vrcp.f32 %v446_v18  ;;  %v458_v22 = vand.u32 2147483648, %v446_v18  ;;  %v456_v24 = vand.u32 2147483647, %v446_v18  ;;  %vm452_vm4 = vweird.f32 %v446_v18 }
  0xb3   : > { %839 = vtanh.f32 %v441_v13 }
  0xb4   : > { %v459_v26 = vor.u32 1.1754944e-38, %v458_v22  ;;  %vm457_vm6 = vcmp.eq.f32.partialorder %v456_v24, 8.507059e+37 }
  0xb8   : > { %v838_v19 = vpop.eup %837 }
  0xb9   : > { %v448_v20 = vmul.f32 %v838_v19, %v446_v18  ;;  %vm453_vm3 = vweird.f32 %v838_v19  ;;  %v840_v29 = vpop.eup %839 }
  0xba   : > { %vm454_vm5 = vmor %vm452_vm4, %vm453_vm3  ;;  %vm632_vm3 = vcmask 261312  }
  0xbb   : > { %v449_v21 = vsub.f32 1.0, %v448_v20 }
  0xbd   : > { %v450_v23 = vmul.f32 %v838_v19, %v449_v21 }
  0xbf   : > { %v451_v25 = vadd.f32 %v838_v19, %v450_v23 }
  0xc1   : > { %v455_v27 = vsel %vm454_vm5, %v838_v19, %v451_v25 }
  0xc2   : > { %v460_v28 = vsel %vm457_vm6, %v459_v26, %v455_v27 }
  0xc3   : > { %463 = vrot.lane.b32.xlu0 %v460_v28, %s987_s17 }
 0x135   : > { %v464_v30 = vpop.permute.xlu0 %463 }
 0x136   : > { %v466_v31 = vmul.f32 %v840_v29, %v464_v30 }
 0x138   : > { %468 = vrot.lane.b32.xlu0 %v466_v31, %s988_s19  ;;  %s989_s19 = smov 16  }
 0x1aa   : > { %v469_v34 = vpop.permute.xlu0 %468 }
 0x1ab   : > { %472 = vst.msk [vmem:[%s1129_s30] sm:$0xff] %vm471_vm7, %v469_v34 }
 0x1b2   : > { %v473_v35 = vld [vmem:[%s1129_s30] sm:$0xff] }
 0x1b3   : > { %v481_v36 = vpack.c.bf16 %v473_v35, %v473_v35  ;;  %v475_v37 = vrot.slane %v473_v35, 4 }
 0x1b5   : > { %748 = vmatmul.msk.bf16.vlgmr.msra.gmra.mxu2 %vm490_vm8, %v481_v36  ;;  %v477_v38 = vsel %vm401_vm0, 0.0, %v475_v37 }
 0x1b6   : > { %v478_v39 = vpack.c.bf16 %v477_v38, %v477_v38 }
 0x1b8   : > { %753 = vmatmul.msk.bf16.vlgmr.msra.gmra.mxu3 %vm490_vm8, %v478_v39 }
 0x238   : > { %v503_v40 = vpop.f32.mrf.mxu2 }
 0x23b   : > { %v525_v42 = vpop.f32.mrf.mxu3 }
 0x23c   : > { %v526_v43 = vadd.f32 %v525_v42, %v503_v40 }
 0x23e   : > { %v533_v44 = vadd.f32 %v833_v41, %v526_v43 }
 0x240   : > { %v754_v45 = vmul.f32 -1.442695, %v533_v44  ;;  %v505_v46 = vpop.f32.mrf.mxu2 }
 0x242   : > { %841 = vpow2.f32 %v754_v45 }
 0x243   : > { %v527_v47 = vpop.f32.mrf.mxu3 }
 0x248   : > { %v842_v48 = vpop.eup %841 }
 0x249   : > { %v538_v49 = vadd.f32 1.0, %v842_v48 }
 0x24b   : > { %843 = vrcp.f32 %v538_v49  ;;  %v550_v53 = vand.u32 2147483648, %v538_v49  ;;  %v548_v55 = vand.u32 2147483647, %v538_v49  ;;  %vm544_vm10 = vweird.f32 %v538_v49 }
 0x24c   : > { %845 = vtanh.f32 %v533_v44 }
 0x24d   : > { %v551_v57 = vor.u32 1.1754944e-38, %v550_v53  ;;  %vm549_vm12 = vcmp.eq.f32.partialorder %v548_v55, 8.507059e+37 }
 0x251   : > { %v844_v50 = vpop.eup %843 }
 0x252   : > { %v540_v51 = vmul.f32 %v844_v50, %v538_v49  ;;  %vm545_vm9 = vweird.f32 %v844_v50  ;;  %v846_v0 = vpop.eup %845 }
 0x253   : > { %vm546_vm11 = vmor %vm544_vm10, %vm545_vm9 }
 0x254   : > { %v541_v52 = vsub.f32 1.0, %v540_v51 }
 0x256   : > { %v542_v54 = vmul.f32 %v844_v50, %v541_v52 }
 0x258   : > { %v543_v56 = vadd.f32 %v844_v50, %v542_v54 }
 0x25a   : > { %v547_v58 = vsel %vm546_vm11, %v844_v50, %v543_v56 }
 0x25b   : > { %v552_v59 = vsel %vm549_vm12, %v551_v57, %v547_v58 }
 0x25c   : > { %555 = vrot.lane.b32.xlu1 %v552_v59, %s987_s17 }
 0x2ce   : > { %v556_v1 = vpop.permute.xlu1 %555 }
 0x2cf   : > { %v558_v2 = vmul.f32 %v846_v0, %v556_v1 }
 0x2d1   : > { %560 = vrot.lane.b32.xlu1 %v558_v2, %s989_s19  ;;  %s645_s19 = scalar_lea.hbm %s1210_s10, %s762_s29  ;;  %s933_s29 = scalar_lea.hbm %s1210_s10, 16 }
 0x2d2   : > { %s649_s25 = sshll.u32 %s645_s19, 4  ;;  %s650_s25 = int_to_ptr.hbm [resolvable:$true] %s649_s25 }
 0x2d3   : > { %s927_s26 = sshra.s32 %s650_s25, 4  ;;  %s928_s26 = int_to_ptr.hbm [resolvable:$true] %s927_s26 }
 0x2d4   : > { %s929_s27 = scalar_lea.hbm %s928_s26, 8  ;;  %p934_p3 = scmp.lt.s32.totalorder %s928_s26, %s1210_s10 }
 0x2d5   : > { %p930_p0 = scmp.ne.s32.totalorder %s928_s26, %s929_s27  ;;  %p935_p4 = scmp.lt.s32.totalorder %s933_s29, %s929_s27 }
 0x2d7   : > { %p931_p1 = pnand %p930_p0, %p1084_p5  ;;  %p936_p7 = por %p935_p4, %p934_p3 }
 0x2d9   : > { %p932_p2 = pneg %p931_p1 }
 0x2db   : > { %p937_p8 = pnand %p936_p7, %p932_p2 }
 0x343   : > { %v561_v4 = vpop.permute.xlu1 %560 }
 0x344   : > { %564 = vst.msk [vmem:[%s1129_s30] sm:$0xff] %vm563_vm13, %v561_v4 }
 0x34b   : > { %v565_v5 = vld [vmem:[%s1129_s30] sm:$0xff] }
 0x34c   : > { %v566_v6 = vpack.c.bf16 %v565_v5, %v565_v5 }
 0x34e   : > { %759 = vmatmul.msk.bf16.vlgmr.msrb.gmra.mxu0 %vm583_vm14, %v566_v6 }
 0x3cb   : > { %v599_v8 = vpop.f32.mrf.mxu0 }
 0x3cc   : > { %v600_v9 = vadd.f32 %v834_v7, %v599_v8 }
 0x3ce   : > { %v760_v10 = vmul.f32 -1.442695, %v600_v9 }
 0x3d0   : > { %847 = vpow2.f32 %v760_v10 }
 0x3d3   : > { %v601_v11 = vpop.f32.mrf.mxu0 }
 0x3d6   : > { %v848_v12 = vpop.eup %847 }
 0x3d7   : > { %v607_v13 = vadd.f32 1.0, %v848_v12 }
 0x3d9   : > { %849 = vrcp.f32 %v607_v13  ;;  %v619_v17 = vand.u32 2147483648, %v607_v13  ;;  %v617_v19 = vand.u32 2147483647, %v607_v13  ;;  %vm613_vm0 = vweird.f32 %v607_v13 }
 0x3da   : > { %851 = vtanh.f32 %v600_v9 }
 0x3db   : > { %v620_v21 = vor.u32 1.1754944e-38, %v619_v17  ;;  %vm618_vm2 = vcmp.eq.f32.partialorder %v617_v19, 8.507059e+37 }
 0x3df   : > { %v850_v14 = vpop.eup %849 }
 0x3e0   : > { %v609_v15 = vmul.f32 %v850_v14, %v607_v13  ;;  %vm614_vm15 = vweird.f32 %v850_v14  ;;  %v852_v24 = vpop.eup %851 }
 0x3e1   : > { %vm615_vm1 = vmor %vm613_vm0, %vm614_vm15 }
 0x3e2   : > { %v610_v16 = vsub.f32 1.0, %v609_v15 }
 0x3e4   : > { %v611_v18 = vmul.f32 %v850_v14, %v610_v16 }
 0x3e6   : > { %v612_v20 = vadd.f32 %v850_v14, %v611_v18 }
 0x3e8   : > { %v616_v22 = vsel %vm615_vm1, %v850_v14, %v612_v20 }
 0x3e9   : > { %v621_v23 = vsel %vm618_vm2, %v620_v21, %v616_v22 }
 0x3ea   : > { %624 = vrot.lane.b32.xlu2 %v621_v23, %s987_s17  ;;  %s635_s17 = scalar_lea.sflag [#allocation4], %s378_s20 }
 0x444   : > { %v625_v25 = vpop.permute.xlu2 %624 }
 0x445   : > { %v627_v26 = vmul.f32 %v852_v24, %v625_v25 }
 0x447   : > { %629 = vrot.lane.b32.xlu2 %v627_v26, %s990_s28 }
 0x4a1   : > { %v630_v27 = vpop.permute.xlu2 %629 }
 0x4a2   : > { %633 = vst.msk [vmem:[%s1129_s30] sm:$0xff] %vm632_vm3, %v630_v27 }
 0x4a3   : > { %940 = shalt.err (!%p937_p8)
}
 0x4a4   : > { %776 = dma.vmem_to_hbm [thread:$0]  (%p1084_p5), %s648_s24, 128, %s650_s25, %s635_s17  }
 0x4a5 PF: > { %p793_p9 = scmp.ge.s32.totalorder %s983_s7, 2  ;;  %s661_s20 = sand.u32 1, %s971_s13  }
 0x4a6   : > { %s662_s30 = scalar_lea.sflag [#allocation4], %s661_s20 }
 0x4a7   : > { %p786_p10 = pnand %p793_p9, %p1088_p6 }
 0x4a9   : > { %p787_p11 = pneg %p786_p10 }
 0x4ab   : > { %966 = dma.done.wait (%p787_p11), %s662_s30, 128  }
 0x4ac   : > { %968 = vsyncadd (%p787_p11), %s662_s30, 4294967168  ;;  %p22_p12 = scmp.ge.s32.totalorder %s1071_s18, 4   ;;  %s1214_s13 = smov %s975_s14 }
 0x4ad   : > { %s1215_s14 = smov %s979_s15  ;;  %s1216_s15 = smov %s1082_s21 }
 0x4ae   : > { %s1217_s7 = smov %s1071_s18  ;;  %24 = sbr.rel (!%p22_p12) target bundleno = 5 (0x5), region = 104 }
 0x4b3   :  { %668 = vsyncpa [#allocation3], 1 }
 0x4b4   :  { %670 = vsyncpa [#allocation3 + $0x1], 1 }
 0x4b5   :  { %671 = vsyncpa [#allocation6], 1 }
 0x4b6   :  { %672 = vsyncpa [#allocation4], 1 }
 0x4b7   :  { %674 = vsyncpa [#allocation4 + $0x1], 1 }

</bundles_post_ra>
